<compile_context>
chip_gen: v6e
topology: v6e:2x2x1
jax: 0.10.0
libtpu: 0.0.40
codegen_flags: <defaults>
</compile_context>

<pallas_src>
import jax
import jax.numpy as jnp
from jax.experimental import pallas as pl
from jax.experimental.pallas import tpu as pltpu


def met_dil_block(x, w1, b1, w2, b2, *, dilation, kernel_size, eps=1e-5):
    B, C, H, W = x.shape
    K = kernel_size
    D = dilation
    assert K % 2 == 1, "padding='same' reproduction assumes odd kernel_size"
    P = D * (K - 1) // 2                  # 'same' padding per side
    HW = H * W
    KK = K * K
    assert HW % 128 == 0, "flattened spatial dim must be a multiple of 128 lanes"

    # Sublane-align the channel dim (also lengthens the MXU contraction).
    Cp = ((C + 7) // 8) * 8

    # ---- wrapper-side packing (static, one-time) ---------------------------
    x2 = x.reshape(B, C, HW)
    if Cp != C:
        x2 = jnp.pad(x2, ((0, 0), (0, Cp - C), (0, 0)))

    def pack_w(w):
        wp = jnp.zeros((Cp, Cp, K, K), w.dtype).at[:C, :C].set(w)
        # column order (kh, kw, ci) -> matches the im2col row order below.
        return (jnp.transpose(wp, (0, 2, 3, 1))
                .reshape(Cp, KK * Cp).astype(jnp.bfloat16))

    w1m = pack_w(w1)
    w2m = pack_w(w2)
    # Non-affine InstanceNorm subtracts the per-channel mean, so the conv
    # biases are exactly cancelled -> drop them (exact, saves VPU + DMA work).
    del b1, b2

    # Per-tap 0/1 validity masks of the shifted plane over the flat H*W axis.
    hh = jnp.arange(H)[:, None]
    ww = jnp.arange(W)[None, :]
    rows = []
    for kh in range(K):
        for kw in range(K):
            dh, dw = kh * D - P, kw * D - P
            valid = ((hh + dh >= 0) & (hh + dh < H) &
                     (ww + dw >= 0) & (ww + dw < W))
            rows.append(valid.reshape(HW))
    masks = jnp.stack(rows, axis=0).astype(jnp.float32)            # (KK, HW)

    # ---- kernel -------------------------------------------------------------
    def kernel(x_ref, m_ref, w1_ref, w2_ref, o_ref, col_ref):
        w1v = w1_ref[...]                       # (Cp, KK*Cp) bf16, VMEM resident
        w2v = w2_ref[...]

        def dil_conv(h, w_mat):
            # im2col: K*K rolled+masked copies of the lane-dense plane written
            # at 8-aligned sublane offsets, then ONE bf16 MXU matmul (f32 acc).
            for kh in range(K):
                for kw in range(K):
                    t = kh * K + kw
                    dh, dw = kh * D - P, kw * D - P
                    s = dh * W + dw
                    if s % HW == 0:
                        rolled = h
                    else:
                        rolled = pltpu.roll(h, shift=(-s) % HW, axis=1)
                    if dh == 0 and dw == 0:      # center tap: mask is all-ones
                        slab = rolled
                    else:
                        slab = rolled * m_ref[pl.ds(t, 1), :]   # (Cp,HW)*(1,HW)
                    col_ref[t * Cp:(t + 1) * Cp, :] = slab
            col = col_ref[...].astype(jnp.bfloat16)             # (KK*Cp, HW)
            return jnp.dot(w_mat, col, preferred_element_type=jnp.float32)

        def inorm_relu(y):
            # One-pass stats (E[y], E[y^2]); fused normalize + ReLU, f32.
            m = jnp.mean(y, axis=1, keepdims=True)
            msq = jnp.mean(y * y, axis=1, keepdims=True)
            var = jnp.maximum(msq - m * m, 0.0)
            return jnp.maximum((y - m) * jax.lax.rsqrt(var + eps), 0.0)

        x_f = x_ref[0].astype(jnp.float32)                      # (Cp, HW)
        y = inorm_relu(dil_conv(x_f, w1v))
        y = inorm_relu(dil_conv(y, w2v))
        o_ref[0] = (x_f + y).astype(o_ref.dtype)                # f32 residual

    # ---- VMEM budget (drives vmem_limit_bytes) ------------------------------
    blk = Cp * HW * x.dtype.itemsize
    vmem_bytes = (
        2 * blk                              # input block  (double-buffered)
        + 2 * blk                            # output block (double-buffered)
        + 2 * KK * HW * 4                    # tap masks
        + 2 * 2 * Cp * KK * Cp * 2           # w1 + w2 (bf16, double-buffered)
        + KK * Cp * HW * 4                   # im2col scratch (f32)
        + 6 * Cp * HW * 4                    # live f32 temporaries
    )
    vmem_limit = int(min(max(2 * vmem_bytes, 32 << 20), 48 << 20))

    grid_spec = pltpu.PrefetchScalarGridSpec(
        num_scalar_prefetch=0,
        grid=(B,),                            # one image per step; >= 2 steps
        in_specs=[
            pl.BlockSpec((1, Cp, HW), lambda b: (b, 0, 0)),      # x (lane-dense)
            pl.BlockSpec((KK, HW), lambda b: (0, 0)),            # tap masks
            pl.BlockSpec((Cp, KK * Cp), lambda b: (0, 0)),       # w1 (bf16)
            pl.BlockSpec((Cp, KK * Cp), lambda b: (0, 0)),       # w2 (bf16)
        ],
        out_specs=pl.BlockSpec((1, Cp, HW), lambda b: (b, 0, 0)),
        scratch_shapes=[pltpu.VMEM((KK * Cp, HW), jnp.float32)],  # im2col slab
    )

    flops = B * (4 * Cp * Cp * KK * HW + 20 * Cp * HW)
    bytes_accessed = (2 * B * Cp * HW * x.dtype.itemsize
                      + 2 * Cp * KK * Cp * 2 + KK * HW * 4)
    cost = pl.CostEstimate(flops=flops, transcendentals=2 * B * Cp,
                           bytes_accessed=bytes_accessed)

    out = pl.pallas_call(
        kernel,
        out_shape=jax.ShapeDtypeStruct((B, Cp, HW), x.dtype),
        grid_spec=grid_spec,
        compiler_params=pltpu.CompilerParams(
            dimension_semantics=("parallel",),
            vmem_limit_bytes=vmem_limit),
        cost_estimate=cost,
    )(x2, masks, w1m, w2m)

    return out[:, :C, :].reshape(B, C, H, W)


def met_dil_block_ref(x, w1, b1, w2, b2, *, dilation, eps=1e-5):
    """Pure-JAX reference (mirrors the PyTorch module, f32 throughout)."""
    def conv(h, w, b):
        y = jax.lax.conv_general_dilated(
            h, w, window_strides=(1, 1), padding="SAME",
            rhs_dilation=(dilation, dilation),
            dimension_numbers=("NCHW", "OIHW", "NCHW"))
        return y + b[None, :, None, None]

    def inorm(y):
        m = y.mean(axis=(2, 3), keepdims=True)
        v = ((y - m) ** 2).mean(axis=(2, 3), keepdims=True)
        return (y - m) / jnp.sqrt(v + eps)

    out = jax.nn.relu(inorm(conv(x, w1, b1)))
    out = jax.nn.relu(inorm(conv(out, w2, b2)))
    return x + out


if __name__ == "__main__":
    B, C, H, W = 2, 4, 16, 16
    K, DIL = 3, 2

    key = jax.random.PRNGKey(0)
    kx, kw1, kb1, kw2, kb2 = jax.random.split(key, 5)
    bound = 1.0 / (C * K * K) ** 0.5     # kaiming-uniform-like deterministic init
    x = jax.random.normal(kx, (B, C, H, W), jnp.float32)
    w1 = jax.random.uniform(kw1, (C, C, K, K), jnp.float32, -bound, bound)
    b1 = jax.random.uniform(kb1, (C,), jnp.float32, -bound, bound)
    w2 = jax.random.uniform(kw2, (C, C, K, K), jnp.float32, -bound, bound)
    b2 = jax.random.uniform(kb2, (C,), jnp.float32, -bound, bound)

    out = met_dil_block(x, w1, b1, w2, b2, dilation=DIL, kernel_size=K)
    out = jax.block_until_ready(out)

    ref = met_dil_block_ref(x, w1, b1, w2, b2, dilation=DIL)
    err_max = float(jnp.max(jnp.abs(out - ref)))
    err_mean = float(jnp.mean(jnp.abs(out - ref)))
    assert out.shape == ref.shape and out.dtype == ref.dtype
    # bf16 MXU operands (f32 accumulate) give ~1e-2-level drift vs the f32
    # reference (flagged in the perf review); real bugs show up as O(1) errors.
    assert err_max < 2e-1 and err_mean < 3e-2, (
        f"mismatch vs reference: max {err_max}, mean {err_mean}")
    print("KERNEL_OK")
</pallas_src>

<mosaic_0001>
module attributes {stable_mosaic.version = 11 : i64} {
  func.func @kernel(%arg0: i32, %arg1: memref<1x8x256xf32, #tpu.memory_space<vmem>>, %arg2: memref<9x256xf32, #tpu.memory_space<vmem>>, %arg3: memref<8x72xbf16, #tpu.memory_space<vmem>>, %arg4: memref<8x72xbf16, #tpu.memory_space<vmem>>, %arg5: memref<1x8x256xf32, #tpu.memory_space<vmem>>, %arg6: memref<72x256xf32, #tpu.memory_space<vmem>>) attributes {dimension_semantics = [#tpu.dimension_semantics<parallel>], iteration_bounds = array<i64: 2>, scalar_prefetch = 0 : i64, scratch_operands = 1 : i64, tpu.core_type = #tpu.core_type<tc>, window_params = [{transform_indices = @transform_0, window_bounds = array<i64: 1, 8, 256>}, {pipeline_mode = #tpu.pipeline_mode<synchronous>, transform_indices = @transform_1, window_bounds = array<i64: 9, 256>}, {pipeline_mode = #tpu.pipeline_mode<synchronous>, transform_indices = @transform_2, window_bounds = array<i64: 8, 72>}, {pipeline_mode = #tpu.pipeline_mode<synchronous>, transform_indices = @transform_3, window_bounds = array<i64: 8, 72>}, {transform_indices = @transform_4, window_bounds = array<i64: 1, 8, 256>}]} {
    %c0 = arith.constant 0 : index
    %c0_0 = arith.constant 0 : index
    %0 = vector.load %arg3[%c0, %c0_0] : memref<8x72xbf16, #tpu.memory_space<vmem>>, vector<8x72xbf16>
    %c0_1 = arith.constant 0 : index
    %c0_2 = arith.constant 0 : index
    %1 = vector.load %arg4[%c0_1, %c0_2] : memref<8x72xbf16, #tpu.memory_space<vmem>>, vector<8x72xbf16>
    %c0_3 = arith.constant 0 : index
    %c0_4 = arith.constant 0 : index
    %c0_5 = arith.constant 0 : index
    %2 = vector.load %arg1[%c0_3, %c0_4, %c0_5] : memref<1x8x256xf32, #tpu.memory_space<vmem>>, vector<1x8x256xf32>
    %3 = vector.shape_cast %2 : vector<1x8x256xf32> to vector<8x256xf32>
    %c34_i32 = arith.constant 34 : i32
    %4 = tpu.dynamic_rotate %3 by %c34_i32 dim 1 : vector<8x256xf32>, i32 -> vector<8x256xf32>
    %c0_6 = arith.constant 0 : index
    %c0_7 = arith.constant 0 : index
    %5 = vector.load %arg2[%c0_6, %c0_7] : memref<9x256xf32, #tpu.memory_space<vmem>>, vector<1x256xf32>
    %6 = vector.broadcast %5 : vector<1x256xf32> to vector<8x256xf32>
    %7 = arith.mulf %4, %6 : vector<8x256xf32>
    %c0_8 = arith.constant 0 : index
    %c0_9 = arith.constant 0 : index
    %8 = vector.load %arg6[%c0_8, %c0_9] : memref<72x256xf32, #tpu.memory_space<vmem>>, vector<8x256xf32>
    tpu.vector_store %arg6[%c0_8, %c0_9], %7 {strides = array<i32>} : memref<72x256xf32, #tpu.memory_space<vmem>>, vector<8x256xf32>,
    %c32_i32 = arith.constant 32 : i32
    %9 = tpu.dynamic_rotate %3 by %c32_i32 dim 1 : vector<8x256xf32>, i32 -> vector<8x256xf32>
    %c1 = arith.constant 1 : index
    %c0_10 = arith.constant 0 : index
    %10 = vector.load %arg2[%c1, %c0_10] : memref<9x256xf32, #tpu.memory_space<vmem>>, vector<1x256xf32>
    %11 = vector.broadcast %10 : vector<1x256xf32> to vector<8x256xf32>
    %12 = arith.mulf %9, %11 : vector<8x256xf32>
    %c8 = arith.constant 8 : index
    %c0_11 = arith.constant 0 : index
    %13 = vector.load %arg6[%c8, %c0_11] : memref<72x256xf32, #tpu.memory_space<vmem>>, vector<8x256xf32>
    tpu.vector_store %arg6[%c8, %c0_11], %12 {strides = array<i32>} : memref<72x256xf32, #tpu.memory_space<vmem>>, vector<8x256xf32>,
    %c30_i32 = arith.constant 30 : i32
    %14 = tpu.dynamic_rotate %3 by %c30_i32 dim 1 : vector<8x256xf32>, i32 -> vector<8x256xf32>
    %c2 = arith.constant 2 : index
    %c0_12 = arith.constant 0 : index
    %15 = vector.load %arg2[%c2, %c0_12] : memref<9x256xf32, #tpu.memory_space<vmem>>, vector<1x256xf32>
    %16 = vector.broadcast %15 : vector<1x256xf32> to vector<8x256xf32>
    %17 = arith.mulf %14, %16 : vector<8x256xf32>
    %c16 = arith.constant 16 : index
    %c0_13 = arith.constant 0 : index
    %18 = vector.load %arg6[%c16, %c0_13] : memref<72x256xf32, #tpu.memory_space<vmem>>, vector<8x256xf32>
    tpu.vector_store %arg6[%c16, %c0_13], %17 {strides = array<i32>} : memref<72x256xf32, #tpu.memory_space<vmem>>, vector<8x256xf32>,
    %c2_i32 = arith.constant 2 : i32
    %19 = tpu.dynamic_rotate %3 by %c2_i32 dim 1 : vector<8x256xf32>, i32 -> vector<8x256xf32>
    %c3 = arith.constant 3 : index
    %c0_14 = arith.constant 0 : index
    %20 = vector.load %arg2[%c3, %c0_14] : memref<9x256xf32, #tpu.memory_space<vmem>>, vector<1x256xf32>
    %21 = vector.broadcast %20 : vector<1x256xf32> to vector<8x256xf32>
    %22 = arith.mulf %19, %21 : vector<8x256xf32>
    %c24 = arith.constant 24 : index
    %c0_15 = arith.constant 0 : index
    %23 = vector.load %arg6[%c24, %c0_15] : memref<72x256xf32, #tpu.memory_space<vmem>>, vector<8x256xf32>
    tpu.vector_store %arg6[%c24, %c0_15], %22 {strides = array<i32>} : memref<72x256xf32, #tpu.memory_space<vmem>>, vector<8x256xf32>,
    %c32 = arith.constant 32 : index
    %c0_16 = arith.constant 0 : index
    %24 = vector.load %arg6[%c32, %c0_16] : memref<72x256xf32, #tpu.memory_space<vmem>>, vector<8x256xf32>
    tpu.vector_store %arg6[%c32, %c0_16], %3 {strides = array<i32>} : memref<72x256xf32, #tpu.memory_space<vmem>>, vector<8x256xf32>,
    %c254_i32 = arith.constant 254 : i32
    %25 = tpu.dynamic_rotate %3 by %c254_i32 dim 1 : vector<8x256xf32>, i32 -> vector<8x256xf32>
    %c5 = arith.constant 5 : index
    %c0_17 = arith.constant 0 : index
    %26 = vector.load %arg2[%c5, %c0_17] : memref<9x256xf32, #tpu.memory_space<vmem>>, vector<1x256xf32>
    %27 = vector.broadcast %26 : vector<1x256xf32> to vector<8x256xf32>
    %28 = arith.mulf %25, %27 : vector<8x256xf32>
    %c40 = arith.constant 40 : index
    %c0_18 = arith.constant 0 : index
    %29 = vector.load %arg6[%c40, %c0_18] : memref<72x256xf32, #tpu.memory_space<vmem>>, vector<8x256xf32>
    tpu.vector_store %arg6[%c40, %c0_18], %28 {strides = array<i32>} : memref<72x256xf32, #tpu.memory_space<vmem>>, vector<8x256xf32>,
    %c226_i32 = arith.constant 226 : i32
    %30 = tpu.dynamic_rotate %3 by %c226_i32 dim 1 : vector<8x256xf32>, i32 -> vector<8x256xf32>
    %c6 = arith.constant 6 : index
    %c0_19 = arith.constant 0 : index
    %31 = vector.load %arg2[%c6, %c0_19] : memref<9x256xf32, #tpu.memory_space<vmem>>, vector<1x256xf32>
    %32 = vector.broadcast %31 : vector<1x256xf32> to vector<8x256xf32>
    %33 = arith.mulf %30, %32 : vector<8x256xf32>
    %c48 = arith.constant 48 : index
    %c0_20 = arith.constant 0 : index
    %34 = vector.load %arg6[%c48, %c0_20] : memref<72x256xf32, #tpu.memory_space<vmem>>, vector<8x256xf32>
    tpu.vector_store %arg6[%c48, %c0_20], %33 {strides = array<i32>} : memref<72x256xf32, #tpu.memory_space<vmem>>, vector<8x256xf32>,
    %c224_i32 = arith.constant 224 : i32
    %35 = tpu.dynamic_rotate %3 by %c224_i32 dim 1 : vector<8x256xf32>, i32 -> vector<8x256xf32>
    %c7 = arith.constant 7 : index
    %c0_21 = arith.constant 0 : index
    %36 = vector.load %arg2[%c7, %c0_21] : memref<9x256xf32, #tpu.memory_space<vmem>>, vector<1x256xf32>
    %37 = vector.broadcast %36 : vector<1x256xf32> to vector<8x256xf32>
    %38 = arith.mulf %35, %37 : vector<8x256xf32>
    %c56 = arith.constant 56 : index
    %c0_22 = arith.constant 0 : index
    %39 = vector.load %arg6[%c56, %c0_22] : memref<72x256xf32, #tpu.memory_space<vmem>>, vector<8x256xf32>
    tpu.vector_store %arg6[%c56, %c0_22], %38 {strides = array<i32>} : memref<72x256xf32, #tpu.memory_space<vmem>>, vector<8x256xf32>,
    %c222_i32 = arith.constant 222 : i32
    %40 = tpu.dynamic_rotate %3 by %c222_i32 dim 1 : vector<8x256xf32>, i32 -> vector<8x256xf32>
    %c8_23 = arith.constant 8 : index
    %c0_24 = arith.constant 0 : index
    %41 = vector.load %arg2[%c8_23, %c0_24] : memref<9x256xf32, #tpu.memory_space<vmem>>, vector<1x256xf32>
    %42 = vector.broadcast %41 : vector<1x256xf32> to vector<8x256xf32>
    %43 = arith.mulf %40, %42 : vector<8x256xf32>
    %c64 = arith.constant 64 : index
    %c0_25 = arith.constant 0 : index
    %44 = vector.load %arg6[%c64, %c0_25] : memref<72x256xf32, #tpu.memory_space<vmem>>, vector<8x256xf32>
    tpu.vector_store %arg6[%c64, %c0_25], %43 {strides = array<i32>} : memref<72x256xf32, #tpu.memory_space<vmem>>, vector<8x256xf32>,
    %c0_26 = arith.constant 0 : index
    %c0_27 = arith.constant 0 : index
    %45 = vector.load %arg6[%c0_26, %c0_27] : memref<72x256xf32, #tpu.memory_space<vmem>>, vector<72x256xf32>
    %46 = arith.truncf %45 : vector<72x256xf32> to vector<72x256xbf16>
    %cst = arith.constant dense<0.000000e+00> : vector<8x256xf32>
    %47 = tpu.matmul %0, %46, %cst {dimension_numbers = #tpu.dot_dimension_numbers<[1], [0], [0], [1], [0, 0, 1, 1], [], []>} : vector<8x72xbf16>, vector<72x256xbf16>, vector<8x256xf32> -> vector<8x256xf32>
    %cst_28 = arith.constant dense<0.000000e+00> : vector<8xf32>
    %48 = vector.multi_reduction <add>, %47, %cst_28 [1] : vector<8x256xf32> to vector<8xf32>
    %49 = vector.shape_cast %48 : vector<8xf32> to vector<8x1xf32>
    %cst_29 = arith.constant 2.560000e+02 : f32
    %50 = vector.broadcast %cst_29 : f32 to vector<8x1xf32>
    %51 = arith.divf %49, %50 : vector<8x1xf32>
    %52 = arith.mulf %47, %47 : vector<8x256xf32>
    %cst_30 = arith.constant dense<0.000000e+00> : vector<8xf32>
    %53 = vector.multi_reduction <add>, %52, %cst_30 [1] : vector<8x256xf32> to vector<8xf32>
    %54 = vector.shape_cast %53 : vector<8xf32> to vector<8x1xf32>
    %cst_31 = arith.constant 2.560000e+02 : f32
    %55 = vector.broadcast %cst_31 : f32 to vector<8x1xf32>
    %56 = arith.divf %54, %55 : vector<8x1xf32>
    %57 = arith.mulf %51, %51 : vector<8x1xf32>
    %58 = arith.subf %56, %57 : vector<8x1xf32>
    %cst_32 = arith.constant 0.000000e+00 : f32
    %59 = vector.broadcast %cst_32 : f32 to vector<8x1xf32>
    %60 = arith.maximumf %58, %59 : vector<8x1xf32>
    %61 = vector.broadcast %51 : vector<8x1xf32> to vector<8x256xf32>
    %62 = arith.subf %47, %61 : vector<8x256xf32>
    %cst_33 = arith.constant 9.99999974E-6 : f32
    %63 = vector.broadcast %cst_33 : f32 to vector<8x1xf32>
    %64 = arith.addf %60, %63 : vector<8x1xf32>
    %65 = math.rsqrt %64 : vector<8x1xf32>
    %66 = vector.broadcast %65 : vector<8x1xf32> to vector<8x256xf32>
    %67 = arith.mulf %62, %66 : vector<8x256xf32>
    %cst_34 = arith.constant 0.000000e+00 : f32
    %68 = vector.broadcast %cst_34 : f32 to vector<8x256xf32>
    %69 = arith.maximumf %67, %68 : vector<8x256xf32>
    %c34_i32_35 = arith.constant 34 : i32
    %70 = tpu.dynamic_rotate %69 by %c34_i32_35 dim 1 : vector<8x256xf32>, i32 -> vector<8x256xf32>
    %c0_36 = arith.constant 0 : index
    %c0_37 = arith.constant 0 : index
    %71 = vector.load %arg2[%c0_36, %c0_37] : memref<9x256xf32, #tpu.memory_space<vmem>>, vector<1x256xf32>
    %72 = vector.broadcast %71 : vector<1x256xf32> to vector<8x256xf32>
    %73 = arith.mulf %70, %72 : vector<8x256xf32>
    %c0_38 = arith.constant 0 : index
    %c0_39 = arith.constant 0 : index
    %74 = vector.load %arg6[%c0_38, %c0_39] : memref<72x256xf32, #tpu.memory_space<vmem>>, vector<8x256xf32>
    tpu.vector_store %arg6[%c0_38, %c0_39], %73 {strides = array<i32>} : memref<72x256xf32, #tpu.memory_space<vmem>>, vector<8x256xf32>,
    %c32_i32_40 = arith.constant 32 : i32
    %75 = tpu.dynamic_rotate %69 by %c32_i32_40 dim 1 : vector<8x256xf32>, i32 -> vector<8x256xf32>
    %c1_41 = arith.constant 1 : index
    %c0_42 = arith.constant 0 : index
    %76 = vector.load %arg2[%c1_41, %c0_42] : memref<9x256xf32, #tpu.memory_space<vmem>>, vector<1x256xf32>
    %77 = vector.broadcast %76 : vector<1x256xf32> to vector<8x256xf32>
    %78 = arith.mulf %75, %77 : vector<8x256xf32>
    %c8_43 = arith.constant 8 : index
    %c0_44 = arith.constant 0 : index
    %79 = vector.load %arg6[%c8_43, %c0_44] : memref<72x256xf32, #tpu.memory_space<vmem>>, vector<8x256xf32>
    tpu.vector_store %arg6[%c8_43, %c0_44], %78 {strides = array<i32>} : memref<72x256xf32, #tpu.memory_space<vmem>>, vector<8x256xf32>,
    %c30_i32_45 = arith.constant 30 : i32
    %80 = tpu.dynamic_rotate %69 by %c30_i32_45 dim 1 : vector<8x256xf32>, i32 -> vector<8x256xf32>
    %c2_46 = arith.constant 2 : index
    %c0_47 = arith.constant 0 : index
    %81 = vector.load %arg2[%c2_46, %c0_47] : memref<9x256xf32, #tpu.memory_space<vmem>>, vector<1x256xf32>
    %82 = vector.broadcast %81 : vector<1x256xf32> to vector<8x256xf32>
    %83 = arith.mulf %80, %82 : vector<8x256xf32>
    %c16_48 = arith.constant 16 : index
    %c0_49 = arith.constant 0 : index
    %84 = vector.load %arg6[%c16_48, %c0_49] : memref<72x256xf32, #tpu.memory_space<vmem>>, vector<8x256xf32>
    tpu.vector_store %arg6[%c16_48, %c0_49], %83 {strides = array<i32>} : memref<72x256xf32, #tpu.memory_space<vmem>>, vector<8x256xf32>,
    %c2_i32_50 = arith.constant 2 : i32
    %85 = tpu.dynamic_rotate %69 by %c2_i32_50 dim 1 : vector<8x256xf32>, i32 -> vector<8x256xf32>
    %c3_51 = arith.constant 3 : index
    %c0_52 = arith.constant 0 : index
    %86 = vector.load %arg2[%c3_51, %c0_52] : memref<9x256xf32, #tpu.memory_space<vmem>>, vector<1x256xf32>
    %87 = vector.broadcast %86 : vector<1x256xf32> to vector<8x256xf32>
    %88 = arith.mulf %85, %87 : vector<8x256xf32>
    %c24_53 = arith.constant 24 : index
    %c0_54 = arith.constant 0 : index
    %89 = vector.load %arg6[%c24_53, %c0_54] : memref<72x256xf32, #tpu.memory_space<vmem>>, vector<8x256xf32>
    tpu.vector_store %arg6[%c24_53, %c0_54], %88 {strides = array<i32>} : memref<72x256xf32, #tpu.memory_space<vmem>>, vector<8x256xf32>,
    %c32_55 = arith.constant 32 : index
    %c0_56 = arith.constant 0 : index
    %90 = vector.load %arg6[%c32_55, %c0_56] : memref<72x256xf32, #tpu.memory_space<vmem>>, vector<8x256xf32>
    tpu.vector_store %arg6[%c32_55, %c0_56], %69 {strides = array<i32>} : memref<72x256xf32, #tpu.memory_space<vmem>>, vector<8x256xf32>,
    %c254_i32_57 = arith.constant 254 : i32
    %91 = tpu.dynamic_rotate %69 by %c254_i32_57 dim 1 : vector<8x256xf32>, i32 -> vector<8x256xf32>
    %c5_58 = arith.constant 5 : index
    %c0_59 = arith.constant 0 : index
    %92 = vector.load %arg2[%c5_58, %c0_59] : memref<9x256xf32, #tpu.memory_space<vmem>>, vector<1x256xf32>
    %93 = vector.broadcast %92 : vector<1x256xf32> to vector<8x256xf32>
    %94 = arith.mulf %91, %93 : vector<8x256xf32>
    %c40_60 = arith.constant 40 : index
    %c0_61 = arith.constant 0 : index
    %95 = vector.load %arg6[%c40_60, %c0_61] : memref<72x256xf32, #tpu.memory_space<vmem>>, vector<8x256xf32>
    tpu.vector_store %arg6[%c40_60, %c0_61], %94 {strides = array<i32>} : memref<72x256xf32, #tpu.memory_space<vmem>>, vector<8x256xf32>,
    %c226_i32_62 = arith.constant 226 : i32
    %96 = tpu.dynamic_rotate %69 by %c226_i32_62 dim 1 : vector<8x256xf32>, i32 -> vector<8x256xf32>
    %c6_63 = arith.constant 6 : index
    %c0_64 = arith.constant 0 : index
    %97 = vector.load %arg2[%c6_63, %c0_64] : memref<9x256xf32, #tpu.memory_space<vmem>>, vector<1x256xf32>
    %98 = vector.broadcast %97 : vector<1x256xf32> to vector<8x256xf32>
    %99 = arith.mulf %96, %98 : vector<8x256xf32>
    %c48_65 = arith.constant 48 : index
    %c0_66 = arith.constant 0 : index
    %100 = vector.load %arg6[%c48_65, %c0_66] : memref<72x256xf32, #tpu.memory_space<vmem>>, vector<8x256xf32>
    tpu.vector_store %arg6[%c48_65, %c0_66], %99 {strides = array<i32>} : memref<72x256xf32, #tpu.memory_space<vmem>>, vector<8x256xf32>,
    %c224_i32_67 = arith.constant 224 : i32
    %101 = tpu.dynamic_rotate %69 by %c224_i32_67 dim 1 : vector<8x256xf32>, i32 -> vector<8x256xf32>
    %c7_68 = arith.constant 7 : index
    %c0_69 = arith.constant 0 : index
    %102 = vector.load %arg2[%c7_68, %c0_69] : memref<9x256xf32, #tpu.memory_space<vmem>>, vector<1x256xf32>
    %103 = vector.broadcast %102 : vector<1x256xf32> to vector<8x256xf32>
    %104 = arith.mulf %101, %103 : vector<8x256xf32>
    %c56_70 = arith.constant 56 : index
    %c0_71 = arith.constant 0 : index
    %105 = vector.load %arg6[%c56_70, %c0_71] : memref<72x256xf32, #tpu.memory_space<vmem>>, vector<8x256xf32>
    tpu.vector_store %arg6[%c56_70, %c0_71], %104 {strides = array<i32>} : memref<72x256xf32, #tpu.memory_space<vmem>>, vector<8x256xf32>,
    %c222_i32_72 = arith.constant 222 : i32
    %106 = tpu.dynamic_rotate %69 by %c222_i32_72 dim 1 : vector<8x256xf32>, i32 -> vector<8x256xf32>
    %c8_73 = arith.constant 8 : index
    %c0_74 = arith.constant 0 : index
    %107 = vector.load %arg2[%c8_73, %c0_74] : memref<9x256xf32, #tpu.memory_space<vmem>>, vector<1x256xf32>
    %108 = vector.broadcast %107 : vector<1x256xf32> to vector<8x256xf32>
    %109 = arith.mulf %106, %108 : vector<8x256xf32>
    %c64_75 = arith.constant 64 : index
    %c0_76 = arith.constant 0 : index
    %110 = vector.load %arg6[%c64_75, %c0_76] : memref<72x256xf32, #tpu.memory_space<vmem>>, vector<8x256xf32>
    tpu.vector_store %arg6[%c64_75, %c0_76], %109 {strides = array<i32>} : memref<72x256xf32, #tpu.memory_space<vmem>>, vector<8x256xf32>,
    %c0_77 = arith.constant 0 : index
    %c0_78 = arith.constant 0 : index
    %111 = vector.load %arg6[%c0_77, %c0_78] : memref<72x256xf32, #tpu.memory_space<vmem>>, vector<72x256xf32>
    %112 = arith.truncf %111 : vector<72x256xf32> to vector<72x256xbf16>
    %cst_79 = arith.constant dense<0.000000e+00> : vector<8x256xf32>
    %113 = tpu.matmul %1, %112, %cst_79 {dimension_numbers = #tpu.dot_dimension_numbers<[1], [0], [0], [1], [0, 0, 1, 1], [], []>} : vector<8x72xbf16>, vector<72x256xbf16>, vector<8x256xf32> -> vector<8x256xf32>
    %cst_80 = arith.constant dense<0.000000e+00> : vector<8xf32>
    %114 = vector.multi_reduction <add>, %113, %cst_80 [1] : vector<8x256xf32> to vector<8xf32>
    %115 = vector.shape_cast %114 : vector<8xf32> to vector<8x1xf32>
    %cst_81 = arith.constant 2.560000e+02 : f32
    %116 = vector.broadcast %cst_81 : f32 to vector<8x1xf32>
    %117 = arith.divf %115, %116 : vector<8x1xf32>
    %118 = arith.mulf %113, %113 : vector<8x256xf32>
    %cst_82 = arith.constant dense<0.000000e+00> : vector<8xf32>
    %119 = vector.multi_reduction <add>, %118, %cst_82 [1] : vector<8x256xf32> to vector<8xf32>
    %120 = vector.shape_cast %119 : vector<8xf32> to vector<8x1xf32>
    %cst_83 = arith.constant 2.560000e+02 : f32
    %121 = vector.broadcast %cst_83 : f32 to vector<8x1xf32>
    %122 = arith.divf %120, %121 : vector<8x1xf32>
    %123 = arith.mulf %117, %117 : vector<8x1xf32>
    %124 = arith.subf %122, %123 : vector<8x1xf32>
    %cst_84 = arith.constant 0.000000e+00 : f32
    %125 = vector.broadcast %cst_84 : f32 to vector<8x1xf32>
    %126 = arith.maximumf %124, %125 : vector<8x1xf32>
    %127 = vector.broadcast %117 : vector<8x1xf32> to vector<8x256xf32>
    %128 = arith.subf %113, %127 : vector<8x256xf32>
    %cst_85 = arith.constant 9.99999974E-6 : f32
    %129 = vector.broadcast %cst_85 : f32 to vector<8x1xf32>
    %130 = arith.addf %126, %129 : vector<8x1xf32>
    %131 = math.rsqrt %130 : vector<8x1xf32>
    %132 = vector.broadcast %131 : vector<8x1xf32> to vector<8x256xf32>
    %133 = arith.mulf %128, %132 : vector<8x256xf32>
    %cst_86 = arith.constant 0.000000e+00 : f32
    %134 = vector.broadcast %cst_86 : f32 to vector<8x256xf32>
    %135 = arith.maximumf %133, %134 : vector<8x256xf32>
    %136 = arith.addf %3, %135 : vector<8x256xf32>
    %c0_87 = arith.constant 0 : index
    %c0_88 = arith.constant 0 : index
    %c0_89 = arith.constant 0 : index
    %137 = vector.load %arg5[%c0_87, %c0_88, %c0_89] : memref<1x8x256xf32, #tpu.memory_space<vmem>>, vector<1x8x256xf32>
    %138 = vector.shape_cast %137 : vector<1x8x256xf32> to vector<8x256xf32>
    %139 = vector.shape_cast %136 : vector<8x256xf32> to vector<1x8x256xf32>
    tpu.vector_store %arg5[%c0_87, %c0_88, %c0_89], %139 {strides = array<i32>} : memref<1x8x256xf32, #tpu.memory_space<vmem>>, vector<1x8x256xf32>,
    return
  }
  func.func @transform_0(%arg0: i32) -> (i32, i32, i32) {
    %c0_i32 = arith.constant 0 : i32
    %c0_i32_0 = arith.constant 0 : i32
    %c0_i32_1 = arith.constant 0 : i32
    return %arg0, %c0_i32, %c0_i32_0 : i32, i32, i32
  }
  func.func @transform_1(%arg0: i32) -> (i32, i32) {
    %c0_i32 = arith.constant 0 : i32
    %c0_i32_0 = arith.constant 0 : i32
    %c0_i32_1 = arith.constant 0 : i32
    return %c0_i32, %c0_i32_0 : i32, i32
  }
  func.func @transform_2(%arg0: i32) -> (i32, i32) {
    %c0_i32 = arith.constant 0 : i32
    %c0_i32_0 = arith.constant 0 : i32
    %c0_i32_1 = arith.constant 0 : i32
    return %c0_i32, %c0_i32_0 : i32, i32
  }
  func.func @transform_3(%arg0: i32) -> (i32, i32) {
    %c0_i32 = arith.constant 0 : i32
    %c0_i32_0 = arith.constant 0 : i32
    %c0_i32_1 = arith.constant 0 : i32
    return %c0_i32, %c0_i32_0 : i32, i32
  }
  func.func @transform_4(%arg0: i32) -> (i32, i32, i32) {
    %c0_i32 = arith.constant 0 : i32
    %c0_i32_0 = arith.constant 0 : i32
    %c0_i32_1 = arith.constant 0 : i32
    return %arg0, %c0_i32, %c0_i32_0 : i32, i32, i32
  }
}

</mosaic_0001>

<bundles_post_ra>
// kernel: tpu_custom_call.1
= control target key start
LH: loop header
LB: loop body
LE: loop exit
PB: predicated region body
PF: predicated region fallthrough
CT: control target
= control target key end

     0   :  { %9 = vsyncpa [#allocation4], 0  ;;  %s1596_s0 = inlined_call_operand.hbm [shape: f32[2,8,256], index: 0, kind: input, shape index: {}]   ;;  %s1597_s1 = inlined_call_operand.hbm [shape: f32[9,256], index: 1, kind: input, shape index: {}]   ;;  %s1598_s2 = inlined_call_operand.hbm [shape: bf16[8,72], index: 2, kind: input, shape index: {}]   ;;  %s1599_s3 = inlined_call_operand.vmem [shape: bf16[8,72], index: 3, kind: input, shape index: {}]   ;;  %s1600_s4 = inlined_call_operand.hbm [shape: f32[2,8,256], index: 4, kind: output, shape index: {}]  }
   0x1   :  { %11 = vsyncpa [#allocation4 + $0x1], 0 }
   0x2   :  { %12 = vsyncpa [#allocation7], 0 }
   0x3   :  { %13 = vsyncpa [#allocation5], 0 }
   0x4   :  { %15 = vsyncpa [#allocation5 + $0x1], 0  ;;  %s1224_s15 = smov 0   ;;  %s1226_s16 = smov 0  }
   0x5   :  { %s1228_s17 = smov 0   ;;  %s1230_s18 = smov 0  }
   0x6 LB: > { %s1245_s19 = sadd.s32 4294967295, %s1182_s18   ;;  %s928_s20 = sadd.s32 4294967294, %s1182_s18   ;;  %s1182_s18 = sphi %s1230_s18, %s1622_s18   ;;  %s1178_s17 = sphi %s1228_s17, %s1621_s17   ;;  %s1174_s16 = sphi %s1226_s16, %s1620_s16   ;;  %s1170_s15 = sphi %s1224_s15, %s1619_s15  }
   0x7   : > { %p41_p0 = scmp.ne.s32.totalorder %s1174_s16, %s1170_s15  ;;  %p1601_p1 = scmp.eq.s32.totalorder %s1245_s19, 0 }
   0x8   : > { %p134_p3 = scmp.eq.s32.totalorder %s928_s20, 1  ;;  %p929_p5 = scmp.ge.s32.totalorder %s1182_s18, 1 }
   0x9   : > { %p1254_p4 = por %p1601_p1, %p41_p0  ;;  %p141_p7 = scmp.lt.s32.totalorder %s1182_s18, 3 }
   0xa   : > { %p1259_p6 = por %p134_p3, %p41_p0  ;;  %s1184_s24 = smov [#allocation6]  }
   0xb   : > { %s1605_s21 = scalar_select %p1254_p4, 1, 0 }
   0xc   : > { %s1606_s22 = scalar_select %p1259_p6, 1, 0 }
   0xd   : > { %p1264_p8 = pnand %p929_p5, %p141_p7  ;;  %s153_s25 = sshll.u32 %s1184_s24, 4  ;;  %s154_s25 = int_to_ptr.vmem [resolvable:$true] %s153_s25 }
   0xe   : > { %s1185_s27 = smov [#allocation8]   ;;  %s1045_s29 = scalar_lea.vmem %s154_s25, 512 }
   0xf   : > { %s1607_s23 = scalar_select %p1264_p8, 1, 0 }
  0x10   : > { %p964_p9 = pneg %p1264_p8  ;;  %s167_s28 = sshll.u32 %s1185_s27, 4  ;;  %s168_s28 = int_to_ptr.vmem [resolvable:$true] %s167_s28 }
  0x11   : > { %p1046_p13 = scmp.ne.s32.totalorder %s154_s25, %s1045_s29  ;;  %p1053_p5 = scmp.lt.s32.totalorder %s154_s25, %s154_s25 }
  0x12   : > { %p1273_p11 = pnand %p964_p9, %p1601_p1  ;;  %p1054_p7 = scmp.lt.s32.totalorder %s1045_s29, %s1045_s29 }
  0x14   : > { %p1036_p12 = pneg %p1273_p11  ;;  %p1055_p10 = por %p1054_p7, %p1053_p5 }
  0x16   : > { %p1048_p0 = pnand %p1046_p13, %p1036_p12 }
  0x18   : > { %p1049_p3 = pneg %p1048_p0 }
  0x1a   : > { %p1056_p9 = pnand %p1055_p10, %p1049_p3 }
  0x1c   : > { %1059 = shalt.err (!%p1056_p9)
}
  0x1d   : > { %s1186_s30 = smov 256   ;;  %s1187_s5 = smov 16  }
  0x1e   : > { %967 = dma.hbm_to_vmem [thread:$0]  (!%p1273_p11), %s1597_s1, 512, %s154_s25, [#allocation7], %s1186_s30, %s1186_s30, %s1187_s5  }
  0x1f   : > { %s1071_s8 = scalar_lea.vmem %s168_s28, 64  ;;  %p1079_p2 = scmp.lt.s32.totalorder %s168_s28, %s168_s28 }
  0x20   : > { %p1072_p1 = scmp.ne.s32.totalorder %s168_s28, %s1071_s8  ;;  %p1080_p6 = scmp.lt.s32.totalorder %s1071_s8, %s1071_s8 }
  0x22   : > { %p1074_p13 = pnand %p1072_p1, %p1036_p12  ;;  %p1081_p5 = por %p1080_p6, %p1079_p2 }
  0x24   : > { %p1075_p0 = pneg %p1074_p13 }
  0x26   : > { %p1082_p10 = pnand %p1081_p5, %p1075_p0 }
  0x28   : > { %1085 = shalt.err (!%p1082_p10)
}
  0x29   : > { %970 = dma.hbm_to_vmem [thread:$0]  (!%p1273_p11), %s1598_s2, 64, %s168_s28, [#allocation7]  }
  0x2a   : > { %s1296_s11 = sadd.s32 1, %s1182_s18   ;;  %s28_s12 = sadd.s32 1, %s1178_s17 }
  0x2b   : > { %s25_s13 = ssub.s32 %s1182_s18, %s1296_s11  ;;  %p35_p1 = scmp.ne.s32.totalorder %s1178_s17, %s1174_s16 }
  0x2c   : > { %p26_p2 = scmp.eq.s32.totalorder %s25_s13, 0  ;;  %p36_p6 = scmp.eq.s32.totalorder %s1182_s18, 0 }
  0x2d   : > { %p1609_p12 = scmp.eq.s32.totalorder %s1245_s19, 1  ;;  %p981_p7 = scmp.lt.s32.totalorder %s1182_s18, 2 }
  0x2e   : > { %s1312_s20 = scalar_select %p26_p2, %s1178_s17, %s28_s12  }
  0x2f   : > { %p1306_p3 = por %p1609_p12, %p35_p1  ;;  %p37_p9 = por %p36_p6, %p35_p1 }
  0x30   : > { %s181_s24 = sand.u32 1, %s1178_s17   ;;  %s950_s26 = sshll.u32 %s1182_s18, 8 }
  0x31   : > { %s1610_s14 = scalar_select %p1306_p3, 1, 0 }
  0x32   : > { %s933_s25 = sshll.u32 %s181_s24, 4  ;;  %s1319_s29 = scalar_lea.hbm %s1596_s0, %s950_s26 }
  0x33   : > { %s185_s30 = scalar_lea.vmem [#allocation3], %s933_s25  ;;  %p1321_p11 = pnand %p981_p7, %p37_p9 }
  0x34   : > { %s193_s5 = sshll.u32 %s185_s30, 4  ;;  %s182_s7 = scalar_lea.sflag [#allocation4], %s181_s24  ;;  %s194_s5 = int_to_ptr.vmem [resolvable:$true] %s193_s5 }
  0x35   : > { %s1086_s8 = scalar_lea.hbm %s1319_s29, 256  ;;  %p1088_p0 = pneg %p1321_p11 }
  0x36   : > { %p1087_p13 = scmp.ne.s32.totalorder %s1319_s29, %s1086_s8  ;;  %s1091_s12 = scalar_lea.hbm %s1596_s0, 512 }
  0x37   : > { %p1092_p1 = scmp.lt.s32.totalorder %s1319_s29, %s1596_s0  ;;  %p1093_p2 = scmp.lt.s32.totalorder %s1091_s12, %s1086_s8 }
  0x38   : > { %p1089_p5 = pnand %p1088_p0, %p1087_p13 }
  0x39   : > { %p1094_p6 = por %p1093_p2, %p1092_p1 }
  0x3a   : > { %p1090_p10 = pneg %p1089_p5 }
  0x3c   : > { %p1095_p12 = pnand %p1094_p6, %p1090_p10 }
  0x3e   : > { %1098 = shalt.err (!%p1095_p12)
}
  0x3f   : > { %s1099_s26 = scalar_lea.vmem %s194_s5, 256  ;;  %s1188_s24 = smov [#allocation3]  }
  0x40   : > { %p1100_p7 = scmp.ne.s32.totalorder %s194_s5, %s1099_s26  ;;  %s1104_s27 = sshll.u32 %s1188_s24, 4  ;;  %s1105_s27 = int_to_ptr.vmem [resolvable:$false] %s1104_s27 }
  0x41   : > { %s1106_s28 = scalar_lea.vmem %s1105_s27, 512  ;;  %p1107_p13 = scmp.lt.s32.totalorder %s194_s5, %s1105_s27 }
  0x42   : > { %p1102_p9 = pnand %p1100_p7, %p1088_p0  ;;  %p1108_p5 = scmp.lt.s32.totalorder %s1106_s28, %s1099_s26 }
  0x44   : > { %p1103_p3 = pneg %p1102_p9  ;;  %p1109_p4 = por %p1108_p5, %p1107_p13 }
  0x46   : > { %p1110_p8 = pnand %p1109_p4, %p1103_p3 }
  0x48   : > { %1113 = shalt.err (!%p1110_p8)
}
  0x49   : > { %974 = dma.hbm_to_vmem [thread:$0]  (!%p1321_p11), %s1319_s29, 256, %s194_s5, %s182_s7  }
  0x4a   : > { %p1612_p10 = scmp.ne.s32.totalorder %s1607_s23, 0 }
  0x4b   : > { %s1342_s30 = sand.u32 (!%p1612_p10), 1, %s1174_s16   ;;  %p1613_p4 = scmp.ne.s32.totalorder (!%p1612_p10), %s1605_s21, 0 }
  0x4c   : > { %202 = sbr.rel (%p1612_p10) target bundleno = 1131 (0x46b), region = 36  ;;  %s937_s8 = sshll.u32 (!%p1612_p10), %s1342_s30, 4 }
  0x4d   : > { %s205_s9 = scalar_lea.sflag (!%p1612_p10), [#allocation4], %s1342_s30  ;;  %s208_s10 = scalar_lea.vmem (!%p1612_p10), [#allocation3], %s937_s8 }
  0x51   : > { %1157 = dma.done.wait (%p1613_p4), %s205_s9, 256  }
  0x52   : > { %1159 = vsyncadd (%p1613_p4), %s205_s9, 4294967040  ;;  %p1614_p8 = scmp.eq.s32.totalorder %s1245_s19, 0 }
  0x54   : > { %1161 = dma.done.wait (%p1614_p8), [#allocation7], 576   ;;  %p1615_p3 = pmov %p1614_p8 }
  0x55   : > { %v1356_v0 = vld [vmem:[%s208_s10] sm:$0xff]  ;;  %s1189_s23 = smov 98   ;;  %s1190_s29 = smov 94   ;;  %v1362_v1 = vld [vmem:[%s208_s10 + $0x8] sm:$0xff]  ;;  %v1195_v2 = vmov 0   ;;  %v250_v3 = vlaneseq  ;;  %vm473_vm3 = vcmask 1043456  }
  0x56   : > { %1163 = vsyncadd (%p1615_p3), [#allocation7], 4294966720  ;;  %369 = vrot.lane.b32.xlu1 %v1356_v0, %s1189_s23  ;;  %417 = vrot.lane.b32.xlu0 %v1356_v0, %s1190_s29  ;;  %s1191_s21 = smov 96   ;;  %s1192_s5 = smov 126   ;;  %vm469_vm9 = vcmask 588800  }
  0x57   : > { %s1193_s6 = smov 30   ;;  %s1194_s7 = smov 2   ;;  %512 = vmatprep.mubr.bf16.mxu0 %v1195_v2  ;;  %790 = vmatprep.mubr.bf16.mxu1 %v1195_v2  ;;  %v258_v4 = vshrl.u32 %v250_v3, 7  ;;  %v1392_v5 = vand.u32 127, %v250_v3 }
  0x58   : > { %s1196_s12 = smov 34   ;;  %s1197_s13 = smov 32   ;;  %v425_v8 = vld [vmem:[#allocation6 + $0x10] ss:$8 sm:$0x3] }
  0x59   : > { %v1394_v6 = vsub.s32 0, %v258_v4  ;;  %v1396_v7 = vsub.s32 1, %v258_v4  ;;  %v377_v11 = vld [vmem:[#allocation6 + $0x6] ss:$8 sm:$0x3]  ;;  %vm421_vm0 = vcmp.lt.s32.totalorder %v1392_v5, 94 }
  0x5a   : > { %371 = vrot.lane.b32.xlu1 %v1362_v1, %s1189_s23  ;;  %419 = vrot.lane.b32.xlu0 %v1362_v1, %s1190_s29  ;;  %v401_v13 = vld [vmem:[#allocation6 + $0x7] ss:$8 sm:$0x3]  ;;  %vm373_vm1 = vcmp.lt.s32.totalorder %v1392_v5, 98  ;;  %vm397_vm2 = vcmp.lt.s32.totalorder %v1392_v5, 96  ;;  %vm349_vm4 = vcmp.lt.s32.totalorder %v1392_v5, 126 }
  0x5b   : > { %v430_v12 = vrot.slane %v425_v8, %v1394_v6  ;;  %v434_v14 = vrot.slane %v425_v8, %v1396_v7  ;;  %v382_v15 = vrot.slane %v377_v11, %v1394_v6  ;;  %v386_v18 = vrot.slane %v377_v11, %v1396_v7  ;;  %v353_v22 = vld [vmem:[#allocation6 + $0x5] ss:$8 sm:$0x3]  ;;  %v303_v49 = vld [vmem:[#allocation6 + $0x2] ss:$8 sm:$0x3] }
  0x5c   : > { %v406_v21 = vrot.slane %v401_v13, %v1394_v6  ;;  %v410_v25 = vrot.slane %v401_v13, %v1396_v7  ;;  %v358_v32 = vrot.slane %v353_v22, %v1394_v6  ;;  %v362_v36 = vrot.slane %v353_v22, %v1396_v7  ;;  %v327_v50 = vld [vmem:[#allocation6 + $0x3] ss:$8 sm:$0x3]  ;;  %v279_v11 = vld [vmem:[#allocation6 + $0x1] ss:$8 sm:$0x3] }
  0x5d   : > { %vm299_vm5 = vcmp.lt.s32.totalorder %v1392_v5, 30  ;;  %v308_v55 = vrot.slane %v303_v49, %v1394_v6  ;;  %v312_v56 = vrot.slane %v303_v49, %v1396_v7  ;;  %vm323_vm6 = vcmp.lt.s32.totalorder %v1392_v5, 2  ;;  %s951_s24 = sshll.u32 %s1245_s19, 8  ;;  %s240_s27 = scalar_lea.vmem [#allocation9], %s937_s8 }
  0x5e   : > { %395 = vrot.lane.b32.xlu1 %v1362_v1, %s1191_s21  ;;  %393 = vrot.lane.b32.xlu0 %v1356_v0, %s1191_s21  ;;  %v332_v57 = vrot.slane %v327_v50, %v1394_v6  ;;  %v336_v58 = vrot.slane %v327_v50, %v1396_v7  ;;  %vm252_vm7 = vcmp.lt.s32.totalorder %v1392_v5, 34  ;;  %vm275_vm8 = vcmp.lt.s32.totalorder %v1392_v5, 32  ;;  %s839_s28 = sshll.u32 %s240_s27, 4  ;;  %p1616_p0 = scmp.ne.s32.totalorder %s1610_s14, 0  ;;  %s840_s28 = int_to_ptr.vmem [resolvable:$true] %s839_s28 }
  0x5f   : > { %s1198_s19 = smov [#allocation9]  }
  0x60   : > { %s1118_s8 = sshll.u32 %s1198_s19, 4  ;;  %s1119_s8 = int_to_ptr.vmem [resolvable:$false] %s1118_s8 }
  0x61   : > { %p1121_p6 = scmp.lt.s32.totalorder %s840_s28, %s1119_s8 }
  0x62   : > { %347 = vrot.lane.b32.xlu1 %v1362_v1, %s1192_s5  ;;  %345 = vrot.lane.b32.xlu0 %v1356_v0, %s1192_s5 }
  0x66   : > { %297 = vrot.lane.b32.xlu1 %v1362_v1, %s1193_s6  ;;  %295 = vrot.lane.b32.xlu0 %v1356_v0, %s1193_s6 }
  0x6a   : > { %321 = vrot.lane.b32.xlu1 %v1362_v1, %s1194_s7  ;;  %319 = vrot.lane.b32.xlu0 %v1356_v0, %s1194_s7 }
  0x6e   : > { %248 = vrot.lane.b32.xlu1 %v1362_v1, %s1196_s12  ;;  %246 = vrot.lane.b32.xlu0 %v1356_v0, %s1196_s12 }
  0x72   : > { %273 = vrot.lane.b32.xlu1 %v1362_v1, %s1197_s13  ;;  %271 = vrot.lane.b32.xlu0 %v1356_v0, %s1197_s13 }
  0xc8   : > { %v370_v9 = vpop.permute.xlu1 %369  ;;  %v418_v10 = vpop.permute.xlu0 %417 }
  0xcc   : > { %v372_v16 = vpop.permute.xlu1 %371  ;;  %v420_v17 = vpop.permute.xlu0 %419 }
  0xcd   : > { %v422_v19 = vsel %vm421_vm0, %v418_v10, %v420_v17  ;;  %v423_v20 = vsel %vm421_vm0, %v420_v17, %v418_v10  ;;  %v374_v23 = vsel %vm373_vm1, %v370_v9, %v372_v16  ;;  %v375_v27 = vsel %vm373_vm1, %v372_v16, %v370_v9  ;;  %v255_v10 = vld [vmem:[#allocation6] ss:$8 sm:$0x3] }
  0xce   : > { %v437_v24 = vmul.f32 %v430_v12, %v422_v19  ;;  %v438_v26 = vmul.f32 %v434_v14, %v423_v20  ;;  %v389_v33 = vmul.f32 %v382_v15, %v374_v23  ;;  %v390_v37 = vmul.f32 %v386_v18, %v375_v27 }
  0xcf   : > { %v260_v16 = vrot.slane %v255_v10, %v1394_v6  ;;  %v264_v17 = vrot.slane %v255_v10, %v1396_v7  ;;  %v284_v18 = vrot.slane %v279_v11, %v1394_v6  ;;  %v288_v19 = vrot.slane %v279_v11, %v1396_v7 }
  0xd0   : > { %v396_v28 = vpop.permute.xlu1 %395  ;;  %v394_v29 = vpop.permute.xlu0 %393  ;;  %v468_v30 = vpack.c.bf16 %v438_v26, %v438_v26  ;;  %v467_v31 = vpack.c.bf16 %v437_v24, %v437_v24 }
  0xd1   : > { %v398_v34 = vsel %vm397_vm2, %v394_v29, %v396_v28  ;;  %v399_v35 = vsel %vm397_vm2, %v396_v28, %v394_v29 }
  0xd2   : > { %v413_v38 = vmul.f32 %v406_v21, %v398_v34  ;;  %v414_v39 = vmul.f32 %v410_v25, %v399_v35  ;;  %941 = vmatprep.subr.msk.bf16.mxu0 %vm473_vm3, %v468_v30  ;;  %v475_v40 = vsel %vm473_vm3, %v467_v31, 0 }
  0xd3   : > { %487 = vmatpush1.bf16.msra.mxu0 %v475_v40 }
  0xd4   : > { %v348_v41 = vpop.permute.xlu1 %347  ;;  %v346_v42 = vpop.permute.xlu0 %345  ;;  %v466_v43 = vpack.c.bf16 %v414_v39, %v390_v37  ;;  %v465_v44 = vpack.c.bf16 %v413_v38, %v389_v33 }
  0xd5   : > { %v350_v45 = vsel %vm349_vm4, %v346_v42, %v348_v41  ;;  %v351_v46 = vsel %vm349_vm4, %v348_v41, %v346_v42 }
  0xd6   : > { %v365_v47 = vmul.f32 %v358_v32, %v350_v45  ;;  %v366_v48 = vmul.f32 %v362_v36, %v351_v46  ;;  %488 = vmatprep.subr.bf16.mxu0 %v466_v43  ;;  %v242_v32 = vld [vmem:[#allocation8] sm:$0xf] }
  0xd7   : > { %489 = vmatpush1.bf16.msra.mxu0 %v465_v44 }
  0xd8   : > { %v298_v51 = vpop.permute.xlu1 %297  ;;  %v296_v52 = vpop.permute.xlu0 %295  ;;  %v464_v53 = vpack.c.bf16 %v366_v48, %v1362_v1  ;;  %v463_v54 = vpack.c.bf16 %v365_v47, %v1356_v0 }
  0xd9   : > { %v300_v59 = vsel %vm299_vm5, %v296_v52, %v298_v51  ;;  %v301_v60 = vsel %vm299_vm5, %v298_v51, %v296_v52 }
  0xda   : > { %490 = vmatprep.subr.bf16.mxu0 %v464_v53  ;;  %v315_v3 = vmul.f32 %v308_v55, %v301_v60  ;;  %v316_v4 = vmul.f32 %v312_v56, %v300_v59  ;;  %v705_v56 = vld [vmem:[#allocation6 + $0x10] ss:$8 sm:$0x3] }
  0xdb   : > { %491 = vmatpush1.bf16.msra.mxu0 %v463_v54 }
  0xdc   : > { %v322_v61 = vpop.permute.xlu1 %321  ;;  %v320_v62 = vpop.permute.xlu0 %319 }
  0xdd   : > { %v324_v63 = vsel %vm323_vm6, %v320_v62, %v322_v61  ;;  %v325_v2 = vsel %vm323_vm6, %v322_v61, %v320_v62 }
  0xde   : > { %v339_v8 = vmul.f32 %v332_v57, %v325_v2  ;;  %v340_v9 = vmul.f32 %v336_v58, %v324_v63  ;;  %v710_v57 = vrot.slane %v705_v56, %v1394_v6  ;;  %v714_v58 = vrot.slane %v705_v56, %v1396_v7  ;;  %v661_v2 = vld [vmem:[#allocation6 + $0x6] ss:$8 sm:$0x3] }
  0xe0   : > { %v249_v12 = vpop.permute.xlu1 %248  ;;  %v247_v13 = vpop.permute.xlu0 %246  ;;  %v462_v14 = vpack.c.bf16 %v340_v9, %v316_v4  ;;  %v461_v15 = vpack.c.bf16 %v339_v8, %v315_v3  ;;  %v683_v4 = vld [vmem:[#allocation6 + $0x7] ss:$8 sm:$0x3] }
  0xe1   : > { %v253_v20 = vsel %vm252_vm7, %v247_v13, %v249_v12  ;;  %v254_v21 = vsel %vm252_vm7, %v249_v12, %v247_v13  ;;  %v666_v12 = vrot.slane %v661_v2, %v1394_v6  ;;  %v670_v13 = vrot.slane %v661_v2, %v1396_v7 }
  0xe2   : > { %492 = vmatprep.subr.bf16.mxu0 %v462_v14  ;;  %v267_v26 = vmul.f32 %v260_v16, %v254_v21  ;;  %v268_v27 = vmul.f32 %v264_v17, %v253_v20  ;;  %v692_v16 = vrot.slane %v683_v4, %v1396_v7  ;;  %v639_v17 = vld [vmem:[#allocation6 + $0x5] ss:$8 sm:$0x3] }
  0xe3   : > { %493 = vmatpush1.bf16.msra.mxu0 %v461_v15  ;;  %v688_v15 = vrot.slane %v683_v4, %v1394_v6 }
  0xe4   : > { %v274_v22 = vpop.permute.xlu1 %273  ;;  %v272_v23 = vpop.permute.xlu0 %271 }
  0xe5   : > { %v276_v24 = vsel %vm275_vm8, %v272_v23, %v274_v22  ;;  %v277_v25 = vsel %vm275_vm8, %v274_v22, %v272_v23 }
  0xe6   : > { %v291_v28 = vmul.f32 %v284_v18, %v277_v25  ;;  %v292_v29 = vmul.f32 %v288_v19, %v276_v24  ;;  %v644_v24 = vrot.slane %v639_v17, %v1394_v6  ;;  %v648_v25 = vrot.slane %v639_v17, %v1396_v7 }
  0xe8   : > { %v460_v30 = vpack.c.bf16 %v292_v29, %v268_v27  ;;  %v459_v31 = vpack.c.bf16 %v291_v28, %v267_v26 }
  0xea   : > { %494 = vmatprep.subr.bf16.mxu0 %v460_v30 }
  0xeb   : > { %495 = vmatpush1.bf16.msra.mxu0 %v459_v31 }
  0xee   : > { %942 = vmatmul.mubr.msk.bf16.vlgmr.msra.gmra.mxu0 %vm469_vm9, %v242_v32 }
 0x1ae   : > { %v514_v33 = vpop.f32.mrf.mxu0 }
 0x1af   : > { %v526_v36 = vmul.f32 %v514_v33, %v514_v33 }
 0x1b0   : > { %v516_v34 = vpop.f32.mrf.mxu0 }
 0x1b1   : > { %v521_v35 = vadd.f32 %v516_v34, %v514_v33  ;;  %v527_v37 = vmul.f32 %v516_v34, %v516_v34 }
 0x1b2   : > { %v518_v38 = vpop.f32.mrf.mxu0 }
 0x1b3   : > { %522 = vadd.xlane.f32.xlu0 %v521_v35  ;;  %v528_v39 = vadd.f32 %v527_v37, %v526_v36  ;;  %v593_v38 = vld [vmem:[#allocation6 + $0x2] ss:$8 sm:$0x3] }
 0x1b4   : > { %v519_v40 = vpop.f32.mrf.mxu0 }
 0x1b5   : > { %529 = vadd.xlane.f32.xlu1 %v528_v39  ;;  %v615_v39 = vld [vmem:[#allocation6 + $0x3] ss:$8 sm:$0x3] }
 0x23c   : > { %v523_v41 = vpop.xlane.xlu0 %522 }
 0x23d   : > { %v525_v42 = vmul.f32 0.00390625, %v523_v41 }
 0x23e   : > { %v530_v43 = vpop.xlane.xlu1 %529 }
 0x23f   : > { %v531_v44 = vmul.f32 0.00390625, %v530_v43  ;;  %v532_v45 = vmul.f32 %v525_v42, %v525_v42  ;;  %v535_v49 = vsub.f32 %v514_v33, %v525_v42  ;;  %v536_v50 = vsub.f32 %v516_v34, %v525_v42 }
 0x241   : > { %v533_v46 = vsub.f32 %v531_v44, %v532_v45  ;;  %v598_v44 = vrot.slane %v593_v38, %v1394_v6  ;;  %v602_v45 = vrot.slane %v593_v38, %v1396_v7 }
 0x243   : > { %v534_v47 = vmax.f32 %v533_v46, 0.0  ;;  %v620_v46 = vrot.slane %v615_v39, %v1394_v6 }
 0x245   : > { %v537_v48 = vadd.f32 1e-05, %v534_v47  ;;  %v624_v47 = vrot.slane %v615_v39, %v1396_v7 }
 0x247   : > { %1030 = vrsqrt.f32 %v537_v48 }
 0x254   : > { %v1031_v51 = vpop.eup %1030 }
 0x255   : > { %v539_v52 = vmul.f32 %v1031_v51, %v535_v49  ;;  %v540_v53 = vmul.f32 %v1031_v51, %v536_v50 }
 0x257   : > { %v1459_v54 = vmax.f32 %v539_v52, 0.0  ;;  %v1461_v55 = vmax.f32 %v540_v53, 0.0 }
 0x259   : > { %701 = vrot.lane.b32.xlu1 %v1461_v55, %s1190_s29  ;;  %699 = vrot.lane.b32.xlu0 %v1459_v54, %s1190_s29  ;;  %s825_s29 = scalar_lea.sflag [#allocation5], %s1342_s30 }
 0x25d   : > { %657 = vrot.lane.b32.xlu1 %v1461_v55, %s1189_s23  ;;  %655 = vrot.lane.b32.xlu0 %v1459_v54, %s1189_s23  ;;  %s1559_s23 = scalar_lea.hbm %s1600_s4, %s951_s24 }
 0x261   : > { %679 = vrot.lane.b32.xlu1 %v1461_v55, %s1191_s21  ;;  %677 = vrot.lane.b32.xlu0 %v1459_v54, %s1191_s21  ;;  %s1114_s21 = scalar_lea.vmem %s840_s28, 256 }
 0x262   : > { %p1115_p11 = scmp.ne.s32.totalorder %s840_s28, %s1114_s21 }
 0x264   : > { %p1116_p1 = pnand %p1115_p11, %p1616_p0 }
 0x265   : > { %635 = vrot.lane.b32.xlu1 %v1461_v55, %s1192_s5  ;;  %633 = vrot.lane.b32.xlu0 %v1459_v54, %s1192_s5  ;;  %s1120_s5 = scalar_lea.vmem %s1119_s8, 512 }
 0x266   : > { %p1117_p2 = pneg %p1116_p1  ;;  %p1122_p12 = scmp.lt.s32.totalorder %s1120_s5, %s1114_s21 }
 0x268   : > { %p1123_p7 = por %p1122_p12, %p1121_p6 }
 0x269   : > { %589 = vrot.lane.b32.xlu1 %v1461_v55, %s1193_s6  ;;  %587 = vrot.lane.b32.xlu0 %v1459_v54, %s1193_s6 }
 0x26a   : > { %p1124_p9 = pnand %p1123_p7, %p1117_p2 }
 0x26d   : > { %611 = vrot.lane.b32.xlu1 %v1461_v55, %s1194_s7  ;;  %609 = vrot.lane.b32.xlu0 %v1459_v54, %s1194_s7 }
 0x271   : > { %545 = vrot.lane.b32.xlu1 %v1461_v55, %s1196_s12  ;;  %543 = vrot.lane.b32.xlu0 %v1459_v54, %s1196_s12 }
 0x275   : > { %567 = vrot.lane.b32.xlu1 %v1461_v55, %s1197_s13  ;;  %565 = vrot.lane.b32.xlu0 %v1459_v54, %s1197_s13 }
 0x2cb   : > { %v702_v59 = vpop.permute.xlu1 %701  ;;  %v700_v60 = vpop.permute.xlu0 %699 }
 0x2cc   : > { %v703_v61 = vsel %vm421_vm0, %v700_v60, %v702_v59  ;;  %v704_v62 = vsel %vm421_vm0, %v702_v59, %v700_v60  ;;  %v571_v59 = vld [vmem:[#allocation6 + $0x1] ss:$8 sm:$0x3] }
 0x2cd   : > { %v717_v63 = vmul.f32 %v710_v57, %v703_v61  ;;  %v718_v3 = vmul.f32 %v714_v58, %v704_v62  ;;  %v549_v58 = vld [vmem:[#allocation6] ss:$8 sm:$0x3]  ;;  %v576_v4 = vrot.slane %v571_v59, %v1394_v6 }
 0x2ce   : > { %v554_v2 = vrot.slane %v549_v58, %v1394_v6 }
 0x2cf   : > { %v658_v8 = vpop.permute.xlu1 %657  ;;  %v656_v9 = vpop.permute.xlu0 %655  ;;  %v748_v10 = vpack.c.bf16 %v718_v3, %v718_v3  ;;  %v747_v11 = vpack.c.bf16 %v717_v63, %v717_v63  ;;  %v558_v3 = vrot.slane %v549_v58, %v1396_v7 }
 0x2d0   : > { %v659_v18 = vsel %vm373_vm1, %v656_v9, %v658_v8  ;;  %v660_v19 = vsel %vm373_vm1, %v658_v8, %v656_v9  ;;  %v580_v8 = vrot.slane %v571_v59, %v1396_v7 }
 0x2d1   : > { %943 = vmatprep.subr.msk.bf16.mxu1 %vm473_vm3, %v748_v10  ;;  %v753_v14 = vsel %vm473_vm3, %v747_v11, 0  ;;  %v673_v26 = vmul.f32 %v666_v12, %v659_v18  ;;  %v674_v27 = vmul.f32 %v670_v13, %v660_v19  ;;  %v243_v19 = vld [vmem:[%s1599_s3] sm:$0xf] }
 0x2d2   : > { %765 = vmatpush1.bf16.msra.mxu1 %v753_v14 }
 0x2d3   : > { %v680_v20 = vpop.permute.xlu1 %679  ;;  %v678_v21 = vpop.permute.xlu0 %677 }
 0x2d4   : > { %v681_v22 = vsel %vm397_vm2, %v678_v21, %v680_v20  ;;  %v682_v23 = vsel %vm397_vm2, %v680_v20, %v678_v21 }
 0x2d5   : > { %v695_v28 = vmul.f32 %v688_v15, %v681_v22  ;;  %v696_v29 = vmul.f32 %v692_v16, %v682_v23 }
 0x2d7   : > { %v636_v30 = vpop.permute.xlu1 %635  ;;  %v634_v31 = vpop.permute.xlu0 %633  ;;  %v746_v32 = vpack.c.bf16 %v696_v29, %v674_v27  ;;  %v745_v33 = vpack.c.bf16 %v695_v28, %v673_v26 }
 0x2d8   : > { %v637_v34 = vsel %vm349_vm4, %v634_v31, %v636_v30  ;;  %v638_v35 = vsel %vm349_vm4, %v636_v30, %v634_v31 }
 0x2d9   : > { %v651_v36 = vmul.f32 %v644_v24, %v637_v34  ;;  %v652_v37 = vmul.f32 %v648_v25, %v638_v35  ;;  %766 = vmatprep.subr.bf16.mxu1 %v746_v32 }
 0x2da   : > { %767 = vmatpush1.bf16.msra.mxu1 %v745_v33 }
 0x2db   : > { %v590_v40 = vpop.permute.xlu1 %589  ;;  %v588_v41 = vpop.permute.xlu0 %587  ;;  %v744_v42 = vpack.c.bf16 %v652_v37, %v1461_v55  ;;  %v743_v43 = vpack.c.bf16 %v651_v36, %v1459_v54 }
 0x2dc   : > { %v591_v48 = vsel %vm299_vm5, %v588_v41, %v590_v40  ;;  %v592_v49 = vsel %vm299_vm5, %v590_v40, %v588_v41 }
 0x2dd   : > { %768 = vmatprep.subr.bf16.mxu1 %v744_v42  ;;  %v605_v54 = vmul.f32 %v598_v44, %v592_v49  ;;  %v606_v55 = vmul.f32 %v602_v45, %v591_v48 }
 0x2de   : > { %769 = vmatpush1.bf16.msra.mxu1 %v743_v43 }
 0x2df   : > { %v612_v50 = vpop.permute.xlu1 %611  ;;  %v610_v51 = vpop.permute.xlu0 %609 }
 0x2e0   : > { %v613_v52 = vsel %vm323_vm6, %v610_v51, %v612_v50  ;;  %v614_v53 = vsel %vm323_vm6, %v612_v50, %v610_v51 }
 0x2e1   : > { %v627_v56 = vmul.f32 %v620_v46, %v614_v53  ;;  %v628_v57 = vmul.f32 %v624_v47, %v613_v52 }
 0x2e3   : > { %v546_v60 = vpop.permute.xlu1 %545  ;;  %v544_v61 = vpop.permute.xlu0 %543  ;;  %v742_v62 = vpack.c.bf16 %v628_v57, %v606_v55  ;;  %v741_v63 = vpack.c.bf16 %v627_v56, %v605_v54 }
 0x2e4   : > { %v547_v9 = vsel %vm252_vm7, %v544_v61, %v546_v60  ;;  %v548_v10 = vsel %vm252_vm7, %v546_v60, %v544_v61 }
 0x2e5   : > { %770 = vmatprep.subr.bf16.mxu1 %v742_v62  ;;  %v561_v15 = vmul.f32 %v554_v2, %v548_v10  ;;  %v562_v16 = vmul.f32 %v558_v3, %v547_v9 }
 0x2e6   : > { %771 = vmatpush1.bf16.msra.mxu1 %v741_v63 }
 0x2e7   : > { %v568_v11 = vpop.permute.xlu1 %567  ;;  %v566_v12 = vpop.permute.xlu0 %565 }
 0x2e8   : > { %v569_v13 = vsel %vm275_vm8, %v566_v12, %v568_v11  ;;  %v570_v14 = vsel %vm275_vm8, %v568_v11, %v566_v12 }
 0x2e9   : > { %v583_v6 = vmul.f32 %v576_v4, %v570_v14  ;;  %v584_v17 = vmul.f32 %v580_v8, %v569_v13 }
 0x2eb   : > { %v740_v7 = vpack.c.bf16 %v584_v17, %v562_v16  ;;  %v739_v18 = vpack.c.bf16 %v583_v6, %v561_v15 }
 0x2ed   : > { %772 = vmatprep.subr.bf16.mxu1 %v740_v7 }
 0x2ee   : > { %773 = vmatpush1.bf16.msra.mxu1 %v739_v18 }
 0x2f1   : > { %944 = vmatmul.mubr.msk.bf16.vlgmr.msra.gmra.mxu1 %vm469_vm9, %v243_v19 }
 0x3b1   : > { %v792_v20 = vpop.f32.mrf.mxu1 }
 0x3b2   : > { %v803_v23 = vmul.f32 %v792_v20, %v792_v20 }
 0x3b3   : > { %v794_v21 = vpop.f32.mrf.mxu1 }
 0x3b4   : > { %v799_v22 = vadd.f32 %v794_v21, %v792_v20  ;;  %v804_v5 = vmul.f32 %v794_v21, %v794_v21 }
 0x3b5   : > { %v796_v24 = vpop.f32.mrf.mxu1 }
 0x3b6   : > { %800 = vadd.xlane.f32.xlu0 %v799_v22  ;;  %v805_v25 = vadd.f32 %v804_v5, %v803_v23 }
 0x3b7   : > { %v797_v26 = vpop.f32.mrf.mxu1 }
 0x3b8   : > { %806 = vadd.xlane.f32.xlu1 %v805_v25 }
 0x43f   : > { %v801_v27 = vpop.xlane.xlu0 %800 }
 0x440   : > { %v802_v28 = vmul.f32 0.00390625, %v801_v27 }
 0x441   : > { %v807_v29 = vpop.xlane.xlu1 %806 }
 0x442   : > { %v808_v30 = vmul.f32 0.00390625, %v807_v29  ;;  %v809_v31 = vmul.f32 %v802_v28, %v802_v28  ;;  %v812_v35 = vsub.f32 %v792_v20, %v802_v28  ;;  %v813_v36 = vsub.f32 %v794_v21, %v802_v28 }
 0x444   : > { %v810_v32 = vsub.f32 %v808_v30, %v809_v31 }
 0x446   : > { %v811_v33 = vmax.f32 %v810_v32, 0.0 }
 0x448   : > { %v814_v34 = vadd.f32 1e-05, %v811_v33 }
 0x44a   : > { %1032 = vrsqrt.f32 %v814_v34 }
 0x457   : > { %v1033_v37 = vpop.eup %1032 }
 0x458   : > { %v816_v38 = vmul.f32 %v1033_v37, %v812_v35  ;;  %v817_v39 = vmul.f32 %v1033_v37, %v813_v36 }
 0x45a   : > { %v818_v40 = vmax.f32 %v816_v38, 0.0  ;;  %v819_v41 = vmax.f32 %v817_v39, 0.0 }
 0x45c   : > { %v820_v42 = vadd.f32 %v818_v40, %v1356_v0  ;;  %v821_v43 = vadd.f32 %v819_v41, %v1362_v1 }
 0x45e   : > { %822 = vst [vmem:[%s240_s27] sm:$0xff] %v820_v42  ;;  %823 = vst [vmem:[%s240_s27 + $0x8] sm:$0xff] %v821_v43 }
 0x45f   : > { %1127 = shalt.err (!%p1124_p9)
}
 0x460   : > { %s1128_s6 = scalar_lea.hbm %s1559_s23, 256  ;;  %s1132_s12 = scalar_lea.hbm %s1600_s4, 512 }
 0x461   : > { %p1129_p13 = scmp.ne.s32.totalorder %s1559_s23, %s1128_s6  ;;  %p1133_p4 = scmp.lt.s32.totalorder %s1559_s23, %s1600_s4 }
 0x462   : > { %p1134_p8 = scmp.lt.s32.totalorder %s1132_s12, %s1128_s6 }
 0x463   : > { %p1130_p5 = pnand %p1129_p13, %p1616_p0 }
 0x464   : > { %p1135_p3 = por %p1134_p8, %p1133_p4 }
 0x465   : > { %p1131_p10 = pneg %p1130_p5 }
 0x467   : > { %p1136_p11 = pnand %p1135_p3, %p1131_p10 }
 0x469   : > { %1139 = shalt.err (!%p1136_p11)
}
 0x46a   : > { %962 = dma.vmem_to_hbm [thread:$0]  (%p1616_p0), %s840_s28, 256, %s1559_s23, %s825_s29  }
 0x46b PF: > { %s851_s26 = sand.u32 1, %s1170_s15   ;;  %p1617_p1 = scmp.ne.s32.totalorder %s1606_s22, 0 }
 0x46c   : > { %p1618_p2 = scmp.ge.s32.totalorder %s1182_s18, 2  ;;  %s852_s24 = scalar_lea.sflag [#allocation5], %s851_s26 }
 0x46e   : > { %p976_p6 = pnand %p1618_p2, %p1617_p1 }
 0x470   : > { %p977_p12 = pneg %p976_p6 }
 0x472   : > { %1165 = dma.done.wait (%p977_p12), %s852_s24, 256  }
 0x473   : > { %1167 = vsyncadd (%p977_p12), %s852_s24, 4294967040  ;;  %p18_p7 = scmp.ge.s32.totalorder %s1296_s11, 4   ;;  %s1619_s15 = smov %s1174_s16 }
 0x474   : > { %s1620_s16 = smov %s1178_s17  ;;  %s1621_s17 = smov %s1312_s20 }
 0x475   : > { %s1622_s18 = smov %s1296_s11  ;;  %20 = sbr.rel (!%p18_p7) target bundleno = 6 (0x6), region = 96 }
 0x47a   :  { %857 = vsyncpa [#allocation4], 1 }
 0x47b   :  { %859 = vsyncpa [#allocation4 + $0x1], 1 }
 0x47c   :  { %860 = vsyncpa [#allocation7], 1 }
 0x47d   :  { %861 = vsyncpa [#allocation5], 1 }
 0x47e   :  { %863 = vsyncpa [#allocation5 + $0x1], 1 }

</bundles_post_ra>
